<compile_context>
chip_gen: v6e
topology: v6e:2x2x1
jax: 0.10.0
libtpu: 0.0.40
codegen_flags: <defaults>
</compile_context>

<pallas_src>
import functools

import numpy as np
import jax
import jax.numpy as jnp
from jax import lax
from jax.experimental import pallas as pl
from jax.experimental.pallas import tpu as pltpu


def _round_up(x, m):
    return -(-x // m) * m


def _class_embedding_kernel(ids_ref, tab_ref, out_ref, acc_ref, *, tc):
    """One grid step: out_tile += onehot(ids_tile, class_tile) @ table_tile.

    ids_ref : VMEM [TN, 1]  int32   (flat class ids for this id tile)
    tab_ref : VMEM [TC, emb]        (one class tile of the embedding table)
    out_ref : VMEM [TN, emb]        (pipelined output block, same tile across c)
    acc_ref : VMEM [TN, emb] f32    (accumulator across the class grid axis)
    """
    c = pl.program_id(1)

    @pl.when(c == 0)
    def _init():
        acc_ref[...] = jnp.zeros_like(acc_ref)

    ids = ids_ref[...]                                          # (TN, 1) int32
    tn = ids.shape[0]
    col = lax.broadcasted_iota(jnp.int32, (tn, tc), 1) + c * tc  # class indices of this tile
    onehot = (col == ids).astype(tab_ref.dtype)                 # (TN, TC) selection matrix

    acc_ref[...] += jnp.dot(
        onehot,
        tab_ref[...],
        preferred_element_type=jnp.float32,
        precision=lax.Precision.HIGHEST,                        # exact f32 selection
    )

    @pl.when(c == pl.num_programs(1) - 1)
    def _store():
        out_ref[...] = acc_ref[...].astype(out_ref.dtype)


def class_embedding(class_id, table, *, max_tn=128, max_tc=512):
    """JAX/Pallas equivalent of ClassEmbedding.forward.

    class_id : int array, any shape (e.g. [batch] or [batch, seq])
    table    : [num_class, embedding_size] embedding weights
    returns  : class_id.shape + (embedding_size,) in table.dtype
    """
    num_class, emb = table.shape
    orig_shape = class_id.shape

    ids = jnp.reshape(class_id, (-1,)).astype(jnp.int32)
    n = ids.shape[0]
    if n == 0:
        return jnp.zeros(orig_shape + (emb,), dtype=table.dtype)

    # Tile sizes (sublane-aligned). TN caps the id tile, TC the class tile.
    tn = min(max_tn, _round_up(n, 8))
    n_pad = _round_up(n, tn)
    tc = min(max_tc, _round_up(num_class, 8))
    c_pad = _round_up(num_class, tc)

    # Pad the flat id list (pad ids = 0 -> valid row; padded outputs sliced off).
    if n_pad != n:
        ids = jnp.pad(ids, (0, n_pad - n))
    ids2d = ids.reshape(n_pad, 1)

    # Pad the class dimension of the table (zero rows are never selected).
    tab = table
    if c_pad != num_class:
        tab = jnp.pad(table, ((0, c_pad - num_class), (0, 0)))

    grid = (n_pad // tn, c_pad // tc)

    out = pl.pallas_call(
        functools.partial(_class_embedding_kernel, tc=tc),
        out_shape=jax.ShapeDtypeStruct((n_pad, emb), table.dtype),
        grid_spec=pltpu.PrefetchScalarGridSpec(
            num_scalar_prefetch=0,
            grid=grid,
            in_specs=[
                pl.BlockSpec((tn, 1), lambda i, c: (i, 0)),     # id tile
                pl.BlockSpec((tc, emb), lambda i, c: (c, 0)),   # table class tile
            ],
            out_specs=pl.BlockSpec((tn, emb), lambda i, c: (i, 0)),
            scratch_shapes=[pltpu.VMEM((tn, emb), jnp.float32)],  # f32 accumulator
        ),
        compiler_params=pltpu.CompilerParams(
            dimension_semantics=("parallel", "arbitrary"),      # id tiles parallel, class axis is the reduction
        ),
    )(ids2d, tab)

    if n_pad != n:
        out = out[:n]
    return out.reshape(orig_shape + (emb,))


if __name__ == "__main__":
    key = jax.random.PRNGKey(0)
    k_tab, k_ids = jax.random.split(key)

    # Small, module-consistent shapes: 16 classes, 128-dim embedding,
    # class_id of shape [batch=2, seq=8].
    num_class = 16
    embedding_size = 128
    table = jax.random.normal(k_tab, (num_class, embedding_size), dtype=jnp.float32)
    class_id = jax.random.randint(k_ids, (2, 8), 0, num_class, dtype=jnp.int32)

    out = class_embedding(class_id, table)
    jax.block_until_ready(out)

    ref = jnp.take(table, class_id, axis=0)                     # pure-JAX reference
    assert out.shape == (2, 8, embedding_size)
    assert out.dtype == table.dtype
    np.testing.assert_allclose(np.asarray(out), np.asarray(ref), rtol=1e-6, atol=1e-6)

    # Also exercise a 1-D id vector (classic ClassEmbedding usage) with non-tile-aligned length.
    class_id_1d = jnp.array([0, 5, 3, 15, 7], dtype=jnp.int32)
    out_1d = class_embedding(class_id_1d, table)
    jax.block_until_ready(out_1d)
    ref_1d = jnp.take(table, class_id_1d, axis=0)
    np.testing.assert_allclose(np.asarray(out_1d), np.asarray(ref_1d), rtol=1e-6, atol=1e-6)

    # And a bf16 table (output dtype must follow the table dtype).
    table_bf16 = table.astype(jnp.bfloat16)
    out_bf16 = class_embedding(class_id, table_bf16)
    jax.block_until_ready(out_bf16)
    ref_bf16 = jnp.take(table_bf16, class_id, axis=0)
    assert out_bf16.dtype == jnp.bfloat16
    np.testing.assert_allclose(np.asarray(out_bf16, dtype=np.float32),
                               np.asarray(ref_bf16, dtype=np.float32), rtol=0, atol=0)

    print("KERNEL_OK")
</pallas_src>

<mosaic_0001>
module attributes {stable_mosaic.version = 11 : i64} {
  func.func @_class_embedding_kernel(%arg0: i32, %arg1: i32, %arg2: memref<16x1xi32, #tpu.memory_space<vmem>>, %arg3: memref<16x128xf32, #tpu.memory_space<vmem>>, %arg4: memref<16x128xf32, #tpu.memory_space<vmem>>, %arg5: memref<16x128xf32, #tpu.memory_space<vmem>>) attributes {dimension_semantics = [#tpu.dimension_semantics<parallel>, #tpu.dimension_semantics<arbitrary>], iteration_bounds = array<i64: 1, 1>, scalar_prefetch = 0 : i64, scratch_operands = 1 : i64, tpu.core_type = #tpu.core_type<tc>, window_params = [{transform_indices = @transform_0, window_bounds = array<i64: 16, 1>}, {transform_indices = @transform_1, window_bounds = array<i64: 16, 128>}, {transform_indices = @transform_2, window_bounds = array<i64: 16, 128>}]} {
    %c0_i32 = arith.constant 0 : i32
    %0 = arith.cmpi eq, %arg1, %c0_i32 : i32
    %1 = arith.extui %0 : i1 to i32
    %c0_i32_0 = arith.constant 0 : i32
    %2 = arith.cmpi ne, %1, %c0_i32_0 : i32
    scf.if %2 {
      %cst_10 = arith.constant 0.000000e+00 : f32
      %20 = vector.broadcast %cst_10 : f32 to vector<16x128xf32>
      %c0_11 = arith.constant 0 : index
      %c0_12 = arith.constant 0 : index
      %21 = vector.load %arg5[%c0_11, %c0_12] : memref<16x128xf32, #tpu.memory_space<vmem>>, vector<16x128xf32>
      tpu.vector_store %arg5[%c0_11, %c0_12], %20 {strides = array<i32>} : memref<16x128xf32, #tpu.memory_space<vmem>>, vector<16x128xf32>,
    } else {
    }
    %c0 = arith.constant 0 : index
    %c0_1 = arith.constant 0 : index
    %3 = vector.load %arg2[%c0, %c0_1] : memref<16x1xi32, #tpu.memory_space<vmem>>, vector<16x1xi32>
    %4 = tpu.iota {dimensions = array<i32: 1>} : vector<16x16xi32>
    %c16_i32 = arith.constant 16 : i32
    %5 = arith.muli %arg1, %c16_i32 : i32
    %6 = vector.broadcast %5 : i32 to vector<16x16xi32>
    %7 = arith.addi %4, %6 : vector<16x16xi32>
    %8 = vector.broadcast %3 : vector<16x1xi32> to vector<16x16xi32>
    %9 = arith.cmpi eq, %7, %8 : vector<16x16xi32>
    %10 = arith.extui %9 : vector<16x16xi1> to vector<16x16xi32>
    %11 = arith.sitofp %10 : vector<16x16xi32> to vector<16x16xf32>
    %c0_2 = arith.constant 0 : index
    %c0_3 = arith.constant 0 : index
    %12 = vector.load %arg5[%c0_2, %c0_3] : memref<16x128xf32, #tpu.memory_space<vmem>>, vector<16x128xf32>
    %c0_4 = arith.constant 0 : index
    %c0_5 = arith.constant 0 : index
    %13 = vector.load %arg3[%c0_4, %c0_5] : memref<16x128xf32, #tpu.memory_space<vmem>>, vector<16x128xf32>
    %cst = arith.constant dense<0.000000e+00> : vector<16x128xf32>
    %14 = tpu.matmul %11, %13, %cst {dimension_numbers = #tpu.dot_dimension_numbers<[1], [0], [0], [1], [0, 0, 1, 1], [], []>, precision = #tpu.contract_precision<fp32>} : vector<16x16xf32>, vector<16x128xf32>, vector<16x128xf32> -> vector<16x128xf32>
    %15 = arith.addf %12, %14 : vector<16x128xf32>
    %c0_6 = arith.constant 0 : index
    %c0_7 = arith.constant 0 : index
    %16 = vector.load %arg5[%c0_6, %c0_7] : memref<16x128xf32, #tpu.memory_space<vmem>>, vector<16x128xf32>
    tpu.vector_store %arg5[%c0_6, %c0_7], %15 {strides = array<i32>} : memref<16x128xf32, #tpu.memory_space<vmem>>, vector<16x128xf32>,
    %c0_i32_8 = arith.constant 0 : i32
    %17 = arith.cmpi eq, %arg1, %c0_i32_8 : i32
    %18 = arith.extui %17 : i1 to i32
    %c0_i32_9 = arith.constant 0 : i32
    %19 = arith.cmpi ne, %18, %c0_i32_9 : i32
    scf.if %19 {
      %c0_10 = arith.constant 0 : index
      %c0_11 = arith.constant 0 : index
      %20 = vector.load %arg5[%c0_10, %c0_11] : memref<16x128xf32, #tpu.memory_space<vmem>>, vector<16x128xf32>
      %c0_12 = arith.constant 0 : index
      %c0_13 = arith.constant 0 : index
      %21 = vector.load %arg4[%c0_12, %c0_13] : memref<16x128xf32, #tpu.memory_space<vmem>>, vector<16x128xf32>
      tpu.vector_store %arg4[%c0_12, %c0_13], %20 {strides = array<i32>} : memref<16x128xf32, #tpu.memory_space<vmem>>, vector<16x128xf32>,
    } else {
    }
    return
  }
  func.func @transform_0(%arg0: i32, %arg1: i32) -> (i32, i32) {
    %c0_i32 = arith.constant 0 : i32
    %c0_i32_0 = arith.constant 0 : i32
    return %arg0, %c0_i32 : i32, i32
  }
  func.func @transform_1(%arg0: i32, %arg1: i32) -> (i32, i32) {
    %c0_i32 = arith.constant 0 : i32
    %c0_i32_0 = arith.constant 0 : i32
    return %arg1, %c0_i32 : i32, i32
  }
  func.func @transform_2(%arg0: i32, %arg1: i32) -> (i32, i32) {
    %c0_i32 = arith.constant 0 : i32
    %c0_i32_0 = arith.constant 0 : i32
    return %arg0, %c0_i32 : i32, i32
  }
}

</mosaic_0001>

<bundles_post_ra>
// kernel: tpu_custom_call.1
= control target key start
LH: loop header
LB: loop body
LE: loop exit
PB: predicated region body
PF: predicated region fallthrough
CT: control target
= control target key end

     0   :  { %v679_v2 = vmov 0   ;;  %s722_s0 = inlined_call_operand.vmem [shape: s32[16,1], index: 0, kind: input, shape index: {}]   ;;  %s723_s1 = inlined_call_operand.vmem [shape: f32[16,128], index: 1, kind: input, shape index: {}]   ;;  %s724_s2 = inlined_call_operand.hbm [shape: f32[16,128], index: 2, kind: output, shape index: {}]  }
   0x1   :  { %v18_v0 = vld [vmem:[%s722_s0] sm:$0xff]  ;;  %v40_v1 = vld [vmem:[%s723_s1 + $0x8] sm:$0xff]  ;;  %656 = vset.pattern.permute.xlu0 %v679_v2 }
   0x2   :  { %v77_v3 = vand.u32 4294901760, %v40_v1  ;;  %v39_v4 = vld [vmem:[%s723_s1] sm:$0xff] }
   0x3   :  { %7 = vsyncpa [#allocation4], 0  ;;  %26 = vperm.xlu0 %656, %v18_v0   ;;  %v80_v5 = vand.u32 4294901760, %v39_v4  ;;  %v19_v6 = vld [vmem:[%s722_s0 + $0x8] sm:$0xff]  ;;  %v20_v15 = vlaneseq  ;;  %vm41_vm0 = vcmask 130048   ;;  %v680_v18 = vmov 0.0  }
   0x4   :  { %v165_v7 = vsub.f32 %v40_v1, %v77_v3  ;;  %609 = vmatprep.subr.mxu0 %v77_v3  ;;  %s681_s0 = smov [#allocation3]  }
   0x5   :  { %v172_v8 = vsub.f32 %v39_v4, %v80_v5  ;;  %610 = vmatpush3.msra.mxu0 %v77_v3  ;;  %v21_v16 = vand.u32 127, %v20_v15  ;;  %s566_s1 = sshll.u32 %s681_s0, 4  ;;  %s567_s1 = int_to_ptr.vmem [resolvable:$true] %s566_s1 }
   0x6   :  { %v166_v9 = vand.u32 4294901760, %v165_v7  ;;  %611 = vmatprep.subr.mxu0 %v80_v5  ;;  %s657_s17 = scalar_lea.vmem %s567_s1, 256  ;;  %p662_p1 = scmp.lt.s32.totalorder %s567_s1, %s567_s1 }
   0x7   :  { %29 = vperm.xlu0 %656, %v19_v6   ;;  %v173_v10 = vand.u32 4294901760, %v172_v8  ;;  %612 = vmatpush3.msra.mxu0 %v80_v5  ;;  %p658_p0 = scmp.ne.s32.totalorder %s567_s1, %s657_s17  ;;  %p663_p2 = scmp.lt.s32.totalorder %s657_s17, %s657_s17 }
   0x8   :  { %v167_v11 = vsub.f32 %v165_v7, %v166_v9  ;;  %623 = vmatprep.subr.mxu0 %v165_v7 }
   0x9   :  { %v174_v12 = vsub.f32 %v172_v8, %v173_v10  ;;  %p664_p3 = por %p663_p2, %p662_p1 }
   0xa   :  { %v168_v13 = vand.u32 4294901760, %v167_v11 }
   0xb   :  { %v175_v14 = vand.u32 4294901760, %v174_v12  ;;  %p665_p4 = pnand %p664_p3, %p658_p0 }
   0xc   :  { %616 = vmatprep.subr.mxu1 %v168_v13 }
   0xd   :  { %617 = vmatpush3.msra.mxu1 %v168_v13 }
   0xe   :  { %618 = vmatprep.subr.mxu1 %v175_v14 }
   0xf   :  { %619 = vmatpush3.msra.mxu1 %v175_v14 }
  0x10   :  { %630 = vmatprep.subr.mxu1 %v77_v3 }
  0x7e   :  { %v27_v17 = vpop.permute.xlu0 %26 }
  0x7f   :  { %vm31_vm1 = vcmp.eq.s32.totalorder %v21_v16, %v27_v17 }
  0x80   :  { %v577_v19 = vsel %vm31_vm1, 1.0, %v680_v18 }
  0x81   :  { %v43_v20 = vsel %vm41_vm0, %v577_v19, 0  ;;  %620 = vmatprep.mubr.msk.f32.mxu1 %vm41_vm0, %v577_v19 }
  0x82   :  { %v116_v21 = vsub.f32 %v43_v20, %v43_v20  ;;  %v30_v22 = vpop.permute.xlu0 %29 }
  0x83   :  { %vm32_vm2 = vcmp.eq.s32.totalorder %v21_v16, %v30_v22 }
  0x84   :  { %v578_v23 = vsel %vm32_vm2, 1.0, %v680_v18  ;;  %v117_v24 = vand.u32 4294901760, %v116_v21 }
  0x85   :  { %v46_v25 = vsel %vm41_vm0, %v578_v23, 0  ;;  %621 = vmatmul.mubr.msk.f32.vlgmr.msra.gmra.mxu1 %vm41_vm0, %v578_v23 }
  0x86   :  { %v126_v26 = vsub.f32 %v46_v25, %v46_v25  ;;  %634 = vmatprep.mubr.f32.mxu1 %v117_v24  ;;  %631 = vmatpush3.msra.mxu1 %v77_v3  ;;  %v118_v27 = vsub.f32 %v116_v21, %v117_v24 }
  0x87   :  { %632 = vmatprep.subr.mxu1 %v80_v5 }
  0x88   :  { %633 = vmatpush3.msra.mxu1 %v80_v5  ;;  %v119_v28 = vand.u32 4294901760, %v118_v27  ;;  %v127_v29 = vand.u32 4294901760, %v126_v26 }
  0x89   :  { %644 = vmatprep.subr.mxu1 %v77_v3 }
  0x8a   :  { %613 = vmatprep.mubr.f32.mxu0 %v119_v28  ;;  %635 = vmatmul.mubr.f32.vlgmr.msra.gmra.mxu1 %v127_v29  ;;  %v128_v30 = vsub.f32 %v126_v26, %v127_v29 }
  0x8b   :  { %645 = vmatpush3.msra.mxu1 %v77_v3  ;;  %648 = vmatprep.mubr.msk.f32.mxu1 %vm41_vm0, %v577_v19 }
  0x8c   :  { %646 = vmatprep.subr.mxu1 %v80_v5  ;;  %v129_v31 = vand.u32 4294901760, %v128_v30 }
  0x8d   :  { %647 = vmatpush3.msra.mxu1 %v80_v5 }
  0x8e   :  { %614 = vmatmul.mubr.f32.vlgmr.msra.gmra.mxu0 %v129_v31  ;;  %649 = vmatmul.mubr.msk.f32.vlgmr.msra.gmra.mxu1 %vm41_vm0, %v578_v23 }
  0x8f   :  { %624 = vmatpush3.msra.mxu0 %v165_v7  ;;  %627 = vmatprep.mubr.f32.mxu0 %v116_v21 }
  0x90   :  { %625 = vmatprep.subr.mxu0 %v172_v8 }
  0x91   :  { %626 = vmatpush3.msra.mxu0 %v172_v8 }
  0x92   :  { %637 = vmatprep.subr.mxu0 %v166_v9  ;;  %628 = vmatmul.mubr.f32.vlgmr.msra.gmra.mxu0 %v126_v26 }
  0x93   :  { %638 = vmatpush3.msra.mxu0 %v166_v9  ;;  %641 = vmatprep.mubr.msk.f32.mxu0 %vm41_vm0, %v577_v19 }
  0x94   :  { %639 = vmatprep.subr.mxu0 %v173_v10 }
  0x95   :  { %640 = vmatpush3.msra.mxu0 %v173_v10 }
  0x96   :  { %642 = vmatmul.mubr.msk.f32.vlgmr.msra.gmra.mxu0 %vm41_vm0, %v578_v23 }
 0x145   :  { %v622_v32 = vpop.f32.mrf.mxu1 }
 0x147   :  { %v212_v33 = vpop.f32.mrf.mxu1 }
 0x14a   :  { %v636_v34 = vpop.f32.mrf.mxu1 }
 0x14c   :  { %v376_v38 = vpop.f32.mrf.mxu1 }
 0x14e   :  { %v615_v35 = vpop.f32.mrf.mxu0  ;;  %v650_v45 = vpop.f32.mrf.mxu1 }
 0x14f   :  { %v219_v37 = vadd.f32 %v622_v32, %v615_v35 }
 0x150   :  { %v121_v36 = vpop.f32.mrf.mxu0  ;;  %v540_v52 = vpop.f32.mrf.mxu1 }
 0x151   :  { %v213_v40 = vadd.f32 %v212_v33, %v121_v36 }
 0x152   :  { %v629_v39 = vpop.f32.mrf.mxu0 }
 0x153   :  { %v302_v41 = vadd.f32 %v629_v39, %v219_v37 }
 0x154   :  { %v294_v42 = vpop.f32.mrf.mxu0 }
 0x155   :  { %v295_v43 = vadd.f32 %v294_v42, %v213_v40  ;;  %v385_v44 = vadd.f32 %v636_v34, %v302_v41 }
 0x156   :  { %v643_v46 = vpop.f32.mrf.mxu0 }
 0x157   :  { %v468_v47 = vadd.f32 %v643_v46, %v385_v44  ;;  %v377_v48 = vadd.f32 %v376_v38, %v295_v43 }
 0x158   :  { %v461_v49 = vpop.f32.mrf.mxu0 }
 0x159   :  { %v547_v50 = vadd.f32 %v650_v45, %v468_v47  ;;  %v462_v51 = vadd.f32 %v461_v49, %v377_v48 }
 0x15b   :  { %560 = vst [vmem:[#allocation3 + $0x8] sm:$0xff] %v547_v50  ;;  %v541_v53 = vadd.f32 %v540_v52, %v462_v51 }
 0x15d   :  { %559 = vst [vmem:[#allocation3] sm:$0xff] %v541_v53 }
 0x15e   :  { %668 = shalt.err (!%p665_p4)
}
 0x15f   :  { %s682_s18 = smov 128   ;;  %s683_s19 = smov 8  }
 0x160   :  { %572 = dma.vmem_to_hbm [thread:$0]  %s567_s1, 256, %s724_s2, [#allocation4], %s682_s18, %s682_s18, %s683_s19  }
 0x161   :  { %677 = dma.done.wait [#allocation4], 256  }
 0x162   :  { %678 = vsyncadd [#allocation4], 4294967040 }
 0x163   :  { %576 = vsyncpa [#allocation4], 1 }

</bundles_post_ra>
